<compile_context>
chip_gen: v6e
topology: v6e:2x2x1
jax: 0.10.0
libtpu: 0.0.40
codegen_flags: <defaults>
</compile_context>

<pallas_src>
import functools
import math

import jax
import jax.numpy as jnp
from jax.experimental import pallas as pl
from jax.experimental.pallas import tpu as pltpu


def _label_smoothing_kernel(x_ref, tgt_ref, *out_refs,
                            smoothing, padding_idx, write_true_dist):
    if write_true_dist:
        td_ref, partial_ref = out_refs
    else:
        (partial_ref,) = out_refs

    x = x_ref[...]                      # (TILE_N, V) f32 log-probs
    tgt = tgt_ref[...]                  # (TILE_N, 1) i32
    n, v = x.shape

    confidence = 1.0 - smoothing
    smooth_val = smoothing / (v - 2)
    # Trace-time constants: zero EUP work inside the kernel.
    log_conf = math.log(confidence) if confidence > 0.0 else 0.0
    log_smooth = math.log(smooth_val) if smooth_val > 0.0 else 0.0

    cols = jax.lax.broadcasted_iota(jnp.int32, (n, v), 1)
    is_tgt = cols == tgt                                      # scatter_(1, target, conf)
    keep = (cols != padding_idx) & (tgt != padding_idx)       # pad column + pad rows

    td = jnp.where(keep,
                   jnp.where(is_tgt, jnp.float32(confidence), jnp.float32(smooth_val)),
                   jnp.float32(0.0))
    if write_true_dist:
        td_ref[...] = td

    # KLDiv(sum): y * (log y - x); entries with y == 0 contribute exactly 0.
    log_td = jnp.where(is_tgt, jnp.float32(log_conf), jnp.float32(log_smooth))
    terms = jnp.where(td > 0, td * (log_td - x), jnp.float32(0.0))

    # Lane-dense per-tile partial sums (rows reduced on the XLU); final sum in JAX.
    partial_ref[...] = jnp.sum(terms, axis=0, keepdims=True)[None]


def _pick_tile_n(n, v, vmem_budget_bytes=48 * 1024 * 1024):
    # ~5 live f32 (tile_n, V) buffers per step (double-buffered x / true_dist + temps).
    for cand in (1024, 512, 256, 128, 64, 32, 16, 8):
        if n % cand == 0 and 5 * cand * v * 4 <= vmem_budget_bytes:
            return cand
    return n  # single block (block equal to full array dims is always legal)


def label_smoothing_loss(x, target, *, size, padding_idx, smoothing,
                         tile_n=None, return_true_dist=True):
    """x: (N, size) f32 log-probs; target: (N,) int.
    Returns (loss, true_dist) or loss alone if return_true_dist=False."""
    n, v = x.shape
    assert v == size
    x = x.astype(jnp.float32)
    tgt2d = target.reshape(n, 1).astype(jnp.int32)

    if tile_n is None:
        tile_n = _pick_tile_n(n, v)
    num_tiles = pl.cdiv(n, tile_n)
    # TODO(synk): for vocab sizes where even a single-row tile overflows VMEM, add a
    # second grid axis over V (iota offsets make the scatter/pad masks tile-aware);
    # not needed for transformer-sized vocabs.

    kernel = functools.partial(
        _label_smoothing_kernel,
        smoothing=float(smoothing),
        padding_idx=int(padding_idx),
        write_true_dist=bool(return_true_dist),
    )

    partial_shape = jax.ShapeDtypeStruct((num_tiles, 1, v), jnp.float32)
    partial_spec = pl.BlockSpec((1, 1, v), lambda i: (i, 0, 0))

    if return_true_dist:
        out_shape = (jax.ShapeDtypeStruct((n, v), jnp.float32), partial_shape)
        out_specs = (pl.BlockSpec((tile_n, v), lambda i: (i, 0)), partial_spec)
    else:
        out_shape = (partial_shape,)
        out_specs = (partial_spec,)

    bytes_accessed = n * v * 4 + n * 4 + num_tiles * v * 4
    if return_true_dist:
        bytes_accessed += n * v * 4
    cost = pl.CostEstimate(flops=8 * n * v, transcendentals=0,
                           bytes_accessed=bytes_accessed)

    vmem_limit = int(min(100 * (1 << 20), max(32 * (1 << 20), 8 * tile_n * v * 4)))

    outs = pl.pallas_call(
        kernel,
        out_shape=out_shape,
        grid=(num_tiles,),
        in_specs=[
            pl.BlockSpec((tile_n, v), lambda i: (i, 0)),
            pl.BlockSpec((tile_n, 1), lambda i: (i, 0)),
        ],
        out_specs=out_specs,
        compiler_params=pltpu.CompilerParams(
            dimension_semantics=("parallel",),
            vmem_limit_bytes=vmem_limit,
        ),
        cost_estimate=cost,
    )(x, tgt2d)

    if return_true_dist:
        true_dist, partials = outs
        return jnp.sum(partials), true_dist
    (partials,) = outs
    return jnp.sum(partials)


def _reference(x, target, *, size, padding_idx, smoothing):
    n, v = x.shape
    confidence = 1.0 - smoothing
    td = jnp.full((n, v), smoothing / (v - 2), dtype=jnp.float32)
    td = td.at[jnp.arange(n), target].set(confidence)
    td = td.at[:, padding_idx].set(0.0)
    td = jnp.where((target == padding_idx)[:, None], 0.0, td)
    terms = jnp.where(td > 0, td * (jnp.log(jnp.where(td > 0, td, 1.0)) - x), 0.0)
    return jnp.sum(terms), td


if __name__ == "__main__":
    SIZE = 128         # vocab size (full 128-lane rows -> unmasked stores)
    N = 16             # number of (batch*seq) rows
    PADDING_IDX = 0
    SMOOTHING = 0.1
    TILE_N = 8         # force a 2-step grid to exercise the pipelined path

    key = jax.random.PRNGKey(0)
    kx, kt = jax.random.split(key)
    logits = jax.random.normal(kx, (N, SIZE), dtype=jnp.float32)
    x = jax.nn.log_softmax(logits, axis=-1)               # module expects log-probs
    target = jax.random.randint(kt, (N,), 0, SIZE, dtype=jnp.int32)
    # force a couple of padding targets to exercise the row-zeroing path
    target = target.at[2].set(PADDING_IDX).at[5].set(PADDING_IDX)

    loss, true_dist = label_smoothing_loss(
        x, target, size=SIZE, padding_idx=PADDING_IDX, smoothing=SMOOTHING,
        tile_n=TILE_N, return_true_dist=True)
    loss = jax.block_until_ready(loss)
    true_dist = jax.block_until_ready(true_dist)

    loss_only = jax.block_until_ready(label_smoothing_loss(
        x, target, size=SIZE, padding_idx=PADDING_IDX, smoothing=SMOOTHING,
        tile_n=TILE_N, return_true_dist=False))

    ref_loss, ref_td = _reference(
        x, target, size=SIZE, padding_idx=PADDING_IDX, smoothing=SMOOTHING)

    assert jnp.allclose(loss, ref_loss, rtol=1e-5, atol=1e-5), (loss, ref_loss)
    assert jnp.allclose(true_dist, ref_td, rtol=1e-6, atol=1e-6)
    assert jnp.allclose(loss_only, ref_loss, rtol=1e-5, atol=1e-5), (loss_only, ref_loss)

    print("KERNEL_OK")
</pallas_src>

<mosaic_0001>
module attributes {stable_mosaic.version = 11 : i64} {
  func.func @_label_smoothing_kernel(%arg0: i32, %arg1: memref<8x128xf32, #tpu.memory_space<vmem>>, %arg2: memref<8x1xi32, #tpu.memory_space<vmem>>, %arg3: memref<8x128xf32, #tpu.memory_space<vmem>>, %arg4: memref<1x1x128xf32, #tpu.memory_space<vmem>>) attributes {dimension_semantics = [#tpu.dimension_semantics<parallel>], iteration_bounds = array<i64: 2>, scalar_prefetch = 0 : i64, scratch_operands = 0 : i64, tpu.core_type = #tpu.core_type<tc>, window_params = [{transform_indices = @transform_0, window_bounds = array<i64: 8, 128>}, {transform_indices = @transform_1, window_bounds = array<i64: 8, 1>}, {transform_indices = @transform_2, window_bounds = array<i64: 8, 128>}, {transform_indices = @transform_3, window_bounds = array<i64: 1, 1, 128>}]} {
    %c0 = arith.constant 0 : index
    %c0_0 = arith.constant 0 : index
    %0 = vector.load %arg1[%c0, %c0_0] : memref<8x128xf32, #tpu.memory_space<vmem>>, vector<8x128xf32>
    %c0_1 = arith.constant 0 : index
    %c0_2 = arith.constant 0 : index
    %1 = vector.load %arg2[%c0_1, %c0_2] : memref<8x1xi32, #tpu.memory_space<vmem>>, vector<8x1xi32>
    %2 = tpu.iota {dimensions = array<i32: 1>} : vector<8x128xi32>
    %3 = vector.broadcast %1 : vector<8x1xi32> to vector<8x128xi32>
    %4 = arith.cmpi eq, %2, %3 : vector<8x128xi32>
    %c0_i32 = arith.constant 0 : i32
    %5 = vector.broadcast %c0_i32 : i32 to vector<8x128xi32>
    %6 = arith.cmpi ne, %2, %5 : vector<8x128xi32>
    %c0_i32_3 = arith.constant 0 : i32
    %7 = vector.broadcast %c0_i32_3 : i32 to vector<8x1xi32>
    %8 = arith.cmpi ne, %1, %7 : vector<8x1xi32>
    %9 = vector.broadcast %8 : vector<8x1xi1> to vector<8x128xi1>
    %10 = arith.andi %6, %9 : vector<8x128xi1>
    %cst = arith.constant 0.899999976 : f32
    %cst_4 = arith.constant 7.93650805E-4 : f32
    %11 = vector.broadcast %cst : f32 to vector<8x128xf32>
    %12 = vector.broadcast %cst_4 : f32 to vector<8x128xf32>
    %13 = arith.select %4, %11, %12 : vector<8x128xi1>, vector<8x128xf32>
    %cst_5 = arith.constant 0.000000e+00 : f32
    %14 = vector.broadcast %cst_5 : f32 to vector<8x128xf32>
    %15 = arith.select %10, %13, %14 : vector<8x128xi1>, vector<8x128xf32>
    %c0_6 = arith.constant 0 : index
    %c0_7 = arith.constant 0 : index
    %16 = vector.load %arg3[%c0_6, %c0_7] : memref<8x128xf32, #tpu.memory_space<vmem>>, vector<8x128xf32>
    tpu.vector_store %arg3[%c0_6, %c0_7], %15 {strides = array<i32>} : memref<8x128xf32, #tpu.memory_space<vmem>>, vector<8x128xf32>,
    %cst_8 = arith.constant -0.105360515 : f32
    %cst_9 = arith.constant -7.1388669 : f32
    %17 = vector.broadcast %cst_8 : f32 to vector<8x128xf32>
    %18 = vector.broadcast %cst_9 : f32 to vector<8x128xf32>
    %19 = arith.select %4, %17, %18 : vector<8x128xi1>, vector<8x128xf32>
    %cst_10 = arith.constant 0.000000e+00 : f32
    %20 = vector.broadcast %cst_10 : f32 to vector<8x128xf32>
    %21 = arith.cmpf ogt, %15, %20 : vector<8x128xf32>
    %22 = arith.subf %19, %0 : vector<8x128xf32>
    %23 = arith.mulf %15, %22 : vector<8x128xf32>
    %cst_11 = arith.constant 0.000000e+00 : f32
    %24 = vector.broadcast %cst_11 : f32 to vector<8x128xf32>
    %25 = arith.select %21, %23, %24 : vector<8x128xi1>, vector<8x128xf32>
    %cst_12 = arith.constant dense<0.000000e+00> : vector<128xf32>
    %26 = vector.multi_reduction <add>, %25, %cst_12 [0] : vector<8x128xf32> to vector<128xf32>
    %27 = vector.shape_cast %26 : vector<128xf32> to vector<1x128xf32>
    %28 = vector.shape_cast %27 : vector<1x128xf32> to vector<1x1x128xf32>
    %c0_13 = arith.constant 0 : index
    %c0_14 = arith.constant 0 : index
    %c0_15 = arith.constant 0 : index
    %29 = vector.load %arg4[%c0_13, %c0_14, %c0_15] : memref<1x1x128xf32, #tpu.memory_space<vmem>>, vector<1x1x128xf32>
    tpu.vector_store %arg4[%c0_13, %c0_14, %c0_15], %28 {strides = array<i32>} : memref<1x1x128xf32, #tpu.memory_space<vmem>>, vector<1x1x128xf32>,
    return
  }
  func.func @transform_0(%arg0: i32) -> (i32, i32) {
    %c0_i32 = arith.constant 0 : i32
    %c0_i32_0 = arith.constant 0 : i32
    return %arg0, %c0_i32 : i32, i32
  }
  func.func @transform_1(%arg0: i32) -> (i32, i32) {
    %c0_i32 = arith.constant 0 : i32
    %c0_i32_0 = arith.constant 0 : i32
    return %arg0, %c0_i32 : i32, i32
  }
  func.func @transform_2(%arg0: i32) -> (i32, i32) {
    %c0_i32 = arith.constant 0 : i32
    %c0_i32_0 = arith.constant 0 : i32
    return %arg0, %c0_i32 : i32, i32
  }
  func.func @transform_3(%arg0: i32) -> (i32, i32, i32) {
    %c0_i32 = arith.constant 0 : i32
    %c0_i32_0 = arith.constant 0 : i32
    %c0_i32_1 = arith.constant 0 : i32
    return %arg0, %c0_i32, %c0_i32_0 : i32, i32, i32
  }
}

</mosaic_0001>

<bundles_post_ra>
// kernel: tpu_custom_call.1
= control target key start
LH: loop header
LB: loop body
LE: loop exit
PB: predicated region body
PF: predicated region fallthrough
CT: control target
= control target key end

     0   :  { %9 = vsyncpa [#allocation3], 0  ;;  %s656_s0 = inlined_call_operand.vmem [shape: f32[16,128], index: 0, kind: input, shape index: {}]   ;;  %s657_s1 = inlined_call_operand.vmem [shape: s32[16,1], index: 1, kind: input, shape index: {}]   ;;  %s658_s2 = inlined_call_operand.hbm [shape: f32[16,128], index: 2, kind: output, shape index: {0}]   ;;  %s659_s3 = inlined_call_operand.hbm [shape: f32[2,1,128], index: 3, kind: output, shape index: {1}]  }
   0x1   :  { %11 = vsyncpa [#allocation3 + $0x1], 0 }
   0x2   :  { %12 = vsyncpa [#allocation5], 0 }
   0x3   :  { %14 = vsyncpa [#allocation5 + $0x1], 0  ;;  %s531_s12 = smov 0   ;;  %s533_s13 = smov 0  }
   0x4   :  { %s535_s14 = smov 0   ;;  %s537_s15 = smov 0  }
   0x5 LB: > { %s552_s16 = sadd.s32 4294967295, %s504_s15   ;;  %s354_s17 = sadd.s32 4294967294, %s504_s15   ;;  %s504_s15 = sphi %s537_s15, %s665_s15   ;;  %s500_s14 = sphi %s535_s14, %s664_s14   ;;  %s496_s13 = sphi %s533_s13, %s663_s13   ;;  %s492_s12 = sphi %s531_s12, %s662_s12  }
   0x6   : > { %s556_s18 = sadd.s32 1, %s504_s15   ;;  %s79_s19 = sadd.s32 1, %s500_s14 }
   0x7   : > { %s76_s20 = ssub.s32 %s504_s15, %s556_s18  ;;  %p89_p0 = scmp.ne.s32.totalorder %s500_s14, %s496_s13 }
   0x8   : > { %p77_p1 = scmp.eq.s32.totalorder %s76_s20, 0  ;;  %p90_p2 = scmp.eq.s32.totalorder %s552_s16, 1 }
   0x9   : > { %p95_p3 = scmp.ne.s32.totalorder %s496_s13, %s492_s12  ;;  %p96_p4 = scmp.eq.s32.totalorder %s354_s17, 1 }
   0xa   : > { %s567_s21 = scalar_select %p77_p1, %s500_s14, %s79_s19  }
   0xb   : > { %p569_p5 = por %p90_p2, %p89_p0  ;;  %p573_p6 = por %p96_p4, %p95_p3 }
   0xc   : > { %p357_p7 = scmp.ge.s32.totalorder %s504_s15, 1  ;;  %p154_p8 = scmp.lt.s32.totalorder %s504_s15, 3 }
   0xe   : > { %p155_p9 = pnand %p357_p7, %p154_p8 }
   0xf   : > { %p185_p10 = scmp.lt.s32.totalorder (!%p155_p9), %s552_s16, 1  ;;  %s585_s29 = sand.u32 (!%p155_p9), 1, %s496_s13  }
  0x10   : > { %158 = sbr.rel (%p155_p9) target bundleno = 195 (0xc3), region = 28  ;;  %s358_s30 = sshll.u32 (!%p155_p9), %s585_s29, 3 }
  0x11   : > { %s362_s7 = sshll.u32 (!%p155_p9), %s552_s16, 7  ;;  %s178_s8 = scalar_lea.vmem (!%p155_p9), [#allocation2], %s358_s30 }
  0x12   : > { %s242_s9 = sshll.u32 (!%p155_p9), %s178_s8, 4  ;;  %s595_s17 = scalar_lea.hbm (!%p155_p9), %s658_s2, %s362_s7  ;;  %s597_s9 = int_to_ptr.vmem [resolvable:$true] %s242_s9 }
  0x13   : > { %s225_s19 = scalar_lea.sflag (!%p155_p9), [#allocation3], %s585_s29  ;;  %s414_s20 = scalar_lea.vmem (!%p155_p9), %s597_s9, 128 }
  0x14   : > { %p415_p11 = scmp.ne.s32.totalorder (!%p155_p9), %s597_s9, %s414_s20 }
  0x15   : > { %v506_v0 = vmov 0   ;;  %s186_s24 = scalar_select %p185_p10, %s552_s16, 1  ;;  %v195_v3 = vlaneseq  ;;  %v507_v7 = vmov -7.138867   ;;  %v508_v10 = vmov 0.0007936508  }
  0x16   : > { %413 = vset.pattern.permute.xlu0 %v506_v0  ;;  %p416_p12 = pnand %p415_p11, %p569_p5 }
  0x17   : > { %s359_s25 = sshll.u32 %s186_s24, 3  ;;  %v196_v4 = vand.u32 127, %v195_v3  ;;  %s509_s24 = smov [#allocation2]  }
  0x18   : > { %s192_s28 = scalar_lea.vmem %s657_s1, %s359_s25  ;;  %s188_s6 = scalar_lea.vmem %s656_s0, %s359_s25 }
  0x19   : > { %v194_v1 = vld [vmem:[%s192_s28] sm:$0xff]  ;;  %vm201_vm2 = vcmp.ne.s32.totalorder %v196_v4, 0  ;;  %p417_p13 = pneg %p416_p12  ;;  %s418_s25 = sshll.u32 %s509_s24, 4  ;;  %s419_s25 = int_to_ptr.vmem [resolvable:$false] %s418_s25 }
  0x1a   : > { %198 = vperm.xlu0 %413, %v194_v1   ;;  %vm202_vm0 = vcmp.ne.s32.totalorder %v194_v1, 0  ;;  %v193_v6 = vld [vmem:[%s188_s6] sm:$0xff]  ;;  %s420_s26 = scalar_lea.vmem %s419_s25, 256  ;;  %p421_p0 = scmp.lt.s32.totalorder %s597_s9, %s419_s25 }
  0x1b   : > { %v203_v2 = vsel %vm202_vm0, 1, %v506_v0  ;;  %p422_p1 = scmp.lt.s32.totalorder %s420_s26, %s414_s20 }
  0x1d   : > { %p423_p2 = por %p422_p1, %p421_p0 }
  0x1e   : > { %205 = vperm.xlu0 %413, %v203_v2  }
  0x1f   : > { %p424_p3 = pnand %p423_p2, %p417_p13 }
  0x95   : > { %v199_v5 = vpop.permute.xlu0 %198 }
  0x96   : > { %vm200_vm1 = vcmp.eq.s32.totalorder %v196_v4, %v199_v5 }
  0x97   : > { %v212_v8 = vsel %vm200_vm1, -0.105360515, %v507_v7  ;;  %v209_v11 = vsel %vm200_vm1, 0.9, %v508_v10 }
  0x98   : > { %v214_v12 = vsub.f32 %v212_v8, %v193_v6 }
  0x99   : > { %v206_v9 = vpop.permute.xlu0 %205 }
  0x9a   : > { %vm207_vm3 = vcmp.eq.s32.totalorder %v206_v9, 1 }
  0x9b   : > { %vm208_vm4 = vmand %vm201_vm2, %vm207_vm3 }
  0x9c   : > { %v210_v13 = vsel %vm208_vm4, %v209_v11, 0.0 }
  0x9d   : > { %vm213_vm5 = vcmp.gt.f32.partialorder %v210_v13, 0.0  ;;  %v215_v14 = vmul.f32 %v214_v12, %v210_v13  ;;  %211 = vst [vmem:[%s178_s8] sm:$0xff] %v210_v13 }
  0x9e   : > { %427 = shalt.err (!%p424_p3)
}
  0x9f   : > { %s428_s27 = scalar_lea.hbm %s595_s17, 128  ;;  %s432_s4 = scalar_lea.hbm %s658_s2, 256 }
  0xa0   : > { %p429_p4 = scmp.ne.s32.totalorder %s595_s17, %s428_s27  ;;  %p433_p9 = scmp.lt.s32.totalorder %s595_s17, %s658_s2 }
  0xa1   : > { %p434_p10 = scmp.lt.s32.totalorder %s432_s4, %s428_s27 }
  0xa2   : > { %p430_p7 = pnand %p429_p4, %p569_p5 }
  0xa3   : > { %p435_p11 = por %p434_p10, %p433_p9 }
  0xa4   : > { %p431_p8 = pneg %p430_p7 }
  0xa6   : > { %p436_p12 = pnand %p435_p11, %p431_p8 }
  0xa8   : > { %439 = shalt.err (!%p436_p12)
}
  0xa9   : > { %366 = dma.vmem_to_hbm [thread:$0]  (%p569_p5), %s597_s9, 128, %s595_s17, %s225_s19   ;;  %v216_v15 = vsel %vm213_vm5, %v215_v14, 0.0 }
  0xaa   : > { %v217_v16 = vrot.slane %v216_v15, 4  ;;  %s363_s7 = sshll.u32 %s552_s16, 4  ;;  %s184_s8 = scalar_lea.vmem [#allocation4], %s585_s29 }
  0xab   : > { %s255_s10 = sshll.u32 %s184_s8, 4  ;;  %s253_s24 = scalar_lea.hbm %s659_s3, %s363_s7  ;;  %s256_s10 = int_to_ptr.vmem [resolvable:$true] %s255_s10 }
  0xac   : > { %v218_v17 = vadd.f32 %v217_v16, %v216_v15  ;;  %s230_s25 = scalar_lea.sflag [#allocation5], %s585_s29  ;;  %s440_s9 = scalar_lea.vmem %s256_s10, 16 }
  0xad   : > { %p441_p13 = scmp.ne.s32.totalorder %s256_s10, %s440_s9  ;;  %s510_s17 = smov [#allocation4]  }
  0xae   : > { %v219_v18 = vrot.slane %v218_v17, 2  ;;  %s444_s19 = sshll.u32 %s510_s17, 4  ;;  %s445_s19 = int_to_ptr.vmem [resolvable:$false] %s444_s19 }
  0xaf   : > { %p442_p0 = pnand %p441_p13, %p569_p5  ;;  %s446_s16 = scalar_lea.vmem %s445_s19, 32 }
  0xb0   : > { %v220_v19 = vadd.f32 %v219_v18, %v218_v17  ;;  %p447_p2 = scmp.lt.s32.totalorder %s256_s10, %s445_s19  ;;  %p448_p3 = scmp.lt.s32.totalorder %s446_s16, %s440_s9 }
  0xb1   : > { %p443_p1 = pneg %p442_p0 }
  0xb2   : > { %v221_v20 = vrot.slane %v220_v19, 1  ;;  %p449_p4 = por %p448_p3, %p447_p2 }
  0xb4   : > { %v222_v21 = vadd.f32 %v221_v20, %v220_v19  ;;  %p450_p7 = pnand %p449_p4, %p443_p1 }
  0xb6   : > { %223 = vst [vmem:[%s184_s8] sm:$0x1] %v222_v21 }
  0xb7   : > { %453 = shalt.err (!%p450_p7)
}
  0xb8   : > { %s454_s26 = scalar_lea.hbm %s253_s24, 16  ;;  %s458_s28 = scalar_lea.hbm %s659_s3, 32 }
  0xb9   : > { %p455_p8 = scmp.ne.s32.totalorder %s253_s24, %s454_s26  ;;  %p459_p11 = scmp.lt.s32.totalorder %s253_s24, %s659_s3 }
  0xba   : > { %p460_p12 = scmp.lt.s32.totalorder %s458_s28, %s454_s26 }
  0xbb   : > { %p456_p9 = pnand %p455_p8, %p569_p5 }
  0xbc   : > { %p461_p13 = por %p460_p12, %p459_p11 }
  0xbd   : > { %p457_p10 = pneg %p456_p9 }
  0xbf   : > { %p462_p0 = pnand %p461_p13, %p457_p10 }
  0xc1   : > { %465 = shalt.err (!%p462_p0)
}
  0xc2   : > { %367 = dma.vmem_to_hbm [thread:$0]  (%p569_p5), %s256_s10, 16, %s253_s24, %s230_s25  }
  0xc3 PF: > { %p377_p1 = scmp.ge.s32.totalorder %s504_s15, 2  ;;  %s267_s5 = sand.u32 1, %s492_s12  }
  0xc4   : > { %s268_s6 = scalar_lea.sflag [#allocation3], %s267_s5 }
  0xc5   : > { %p371_p2 = pnand %p377_p1, %p573_p6 }
  0xc7   : > { %p372_p3 = pneg %p371_p2 }
  0xc9   : > { %483 = dma.done.wait (%p372_p3), %s268_s6, 128  }
  0xca   : > { %485 = vsyncadd (%p372_p3), %s268_s6, 4294967168  ;;  %s277_s7 = scalar_lea.sflag [#allocation5], %s267_s5 }
  0xcb   : > { %487 = dma.done.wait (%p372_p3), %s277_s7, 16  }
  0xcc   : > { %489 = vsyncadd (%p372_p3), %s277_s7, 4294967280  ;;  %p17_p5 = scmp.ge.s32.totalorder %s556_s18, 4   ;;  %s662_s12 = smov %s496_s13 }
  0xcd   : > { %s663_s13 = smov %s500_s14  ;;  %s664_s14 = smov %s567_s21 }
  0xce   : > { %s665_s15 = smov %s556_s18  ;;  %19 = sbr.rel (!%p17_p5) target bundleno = 5 (0x5), region = 83 }
  0xd3   :  { %281 = vsyncpa [#allocation3], 1 }
  0xd4   :  { %283 = vsyncpa [#allocation3 + $0x1], 1 }
  0xd5   :  { %284 = vsyncpa [#allocation5], 1 }
  0xd6   :  { %286 = vsyncpa [#allocation5 + $0x1], 1 }

</bundles_post_ra>
